<compile_context>
chip_gen: v5e
topology: v5e:2x2
jax: 0.10.0
libtpu: 0.0.40
codegen_flags: <defaults>
</compile_context>

<pallas_src>
import jax
import jax.numpy as jnp
from jax import lax
from jax.experimental import pallas as pl
from jax.experimental.pallas import tpu as pltpu

_LANES = 128
_TARGET_BLOCK_BYTES = 6 * 1024 * 1024   # per-buffer block size (before 2x buffering)
_VMEM_LIMIT_BYTES = 40 * 1024 * 1024    # <= ~48 MiB -> safe on v7x (64 MiB physical VMEM)
_MIN_SPLIT_BYTES = 2 * 1024 * 1024      # only split a single-step grid if it is this big
_MAX_UNROLL_SAMPLES = 32                # static unroll of the per-sample loop up to here


def _cdiv(a, b):
    return -(-a // b)


def _drop_path_kernel(scale_ref, x_ref, o_ref):
    """DropPath body.

    scale_ref : f32[padded_B] in SMEM (scalar prefetch) -- per-sample scale
                (keep ? 1/keep_prob : 0).
    x_ref/o_ref : VMEM blocks of shape (b_tile, r_tile, 128); leading dim is
                whole samples packed into this block.
    """
    bi = pl.program_id(0)
    b_tile = x_ref.shape[0]
    base = bi * b_tile

    def one_sample(j):
        # Native-dtype multiply (no f32 round trip for bf16 inputs).
        s = scale_ref[base + j].astype(o_ref.dtype)
        o_ref[j] = x_ref[j] * s

    if b_tile <= _MAX_UNROLL_SAMPLES:
        for j in range(b_tile):          # static unroll
            one_sample(j)
    else:
        def body(j, carry):
            one_sample(j)
            return carry
        lax.fori_loop(0, b_tile, body, 0)


def drop_path(x, drop_prob: float = 0.0, training: bool = False, *, key=None):
    """Pallas implementation of timm's drop_path.  x is (B, ...) e.g. NCHW."""
    if drop_prob == 0.0 or not training:
        return x
    if x.size == 0:
        return x

    keep_prob = 1.0 - drop_prob
    B = x.shape[0]

    if keep_prob <= 0.0:
        # Guard drop_prob == 1.0 (timm-style): every sample is dropped, no NaN.
        return jnp.zeros_like(x)

    if key is None:
        raise ValueError("drop_path in training mode requires an explicit PRNG `key`")

    # torch semantics: floor(keep_prob + U[0,1)) in {0,1}; kept samples scaled
    # by 1/keep_prob.  Precompute the per-sample f32 scale on the host.
    u = jax.random.uniform(key, (B,), dtype=jnp.float32)
    keep_mask = jnp.floor(jnp.float32(keep_prob) + u)
    scale = keep_mask * jnp.float32(1.0 / keep_prob)          # f32[B]

    N = x.size // B
    if N % _LANES != 0:
        # Ragged trailing size: one fused XLA broadcast multiply is already at
        # HBM roofline; a Pallas path would need a pad + post-slice (2-3x traffic).
        bshape = (B,) + (1,) * (x.ndim - 1)
        return x * scale.reshape(bshape).astype(x.dtype)

    R = N // _LANES
    x3 = x.reshape(B, R, _LANES)          # free reshape, lane-dense layout

    # --- tile selection -----------------------------------------------------
    itemsize = jnp.dtype(x.dtype).itemsize
    target_rows = max(8, _TARGET_BLOCK_BYTES // (_LANES * itemsize))
    if R >= target_rows:
        r_tile = (target_rows // 8) * 8   # multiple of 8 sublanes
        b_tile = 1
    else:
        r_tile = R                        # full per-sample extent
        b_tile = min(B, max(1, target_rows // R))   # pack whole samples per block

    grid_b = _cdiv(B, b_tile)
    grid_r = _cdiv(R, r_tile)

    # v7x has 2 TensorCores sharing the grid: give a non-trivial problem at
    # least 2 parallel steps.  (v5e/v6e: one extra ~0.35us step, negligible.)
    total_bytes = B * N * itemsize
    if grid_b * grid_r == 1 and total_bytes >= _MIN_SPLIT_BYTES:
        if R >= 16:
            r_tile = min(R, ((_cdiv(R, 2) + 7) // 8) * 8)
            grid_r = _cdiv(R, r_tile)
        elif b_tile >= 2:
            b_tile = _cdiv(b_tile, 2)
            grid_b = _cdiv(B, b_tile)

    # Pad the tiny per-sample scale vector so OOB-sample reads in the last
    # (partial) batch block stay in bounds.
    padded_B = grid_b * b_tile
    if padded_B > B:
        scale = jnp.pad(scale, (0, padded_B - B))

    grid_spec = pltpu.PrefetchScalarGridSpec(
        num_scalar_prefetch=1,
        grid=(grid_b, grid_r),
        in_specs=[
            pl.BlockSpec((b_tile, r_tile, _LANES), lambda bi, ri, s: (bi, ri, 0)),
        ],
        out_specs=pl.BlockSpec((b_tile, r_tile, _LANES), lambda bi, ri, s: (bi, ri, 0)),
    )

    out = pl.pallas_call(
        _drop_path_kernel,
        out_shape=jax.ShapeDtypeStruct((B, R, _LANES), x.dtype),
        grid_spec=grid_spec,
        compiler_params=pltpu.CompilerParams(
            dimension_semantics=("parallel", "parallel"),
            vmem_limit_bytes=_VMEM_LIMIT_BYTES,
        ),
    )(scale, x3)

    return out.reshape(x.shape)


class DropPath:
    """Mirror of the PyTorch DropPath module (no parameters)."""

    def __init__(self, drop_prob=None):
        self.drop_prob = drop_prob
        self.training = True

    def __call__(self, x, key=None):
        p = 0.0 if self.drop_prob is None else float(self.drop_prob)
        return drop_path(x, p, self.training, key=key)


if __name__ == "__main__":
    key = jax.random.PRNGKey(0)
    B, C, H, W = 2, 4, 16, 16
    x = jax.random.normal(key, (B, C, H, W), dtype=jnp.float32)

    drop_prob = 0.25
    keep_prob = 1.0 - drop_prob
    mask_key = jax.random.PRNGKey(1234)

    module = DropPath(drop_prob)
    module.training = True
    y = jax.block_until_ready(module(x, key=mask_key))

    assert y.shape == x.shape and y.dtype == x.dtype

    # Reference: same per-sample keep mask, applied with plain XLA.
    u = jax.random.uniform(mask_key, (B,), dtype=jnp.float32)
    ref_scale = jnp.floor(jnp.float32(keep_prob) + u) / jnp.float32(keep_prob)
    y_ref = x * ref_scale.reshape(B, 1, 1, 1)
    assert bool(jnp.allclose(y, y_ref, atol=1e-5, rtol=1e-5))

    # Each sample must be entirely kept (scaled by 1/keep_prob) or entirely zero.
    for b in range(B):
        kept = bool(jnp.allclose(y[b], x[b] / keep_prob, atol=1e-5))
        dropped = bool(jnp.allclose(y[b], 0.0, atol=1e-7))
        assert kept or dropped, "sample must be entirely kept or entirely dropped"

    # drop_prob == 1.0 is guarded (all samples dropped, no NaNs).
    y_all = jax.block_until_ready(drop_path(x, 1.0, True, key=mask_key))
    assert bool(jnp.all(y_all == 0.0))

    # Eval mode (or drop_prob == 0) is exact identity, matching PyTorch.
    module.training = False
    y_eval = jax.block_until_ready(module(x))
    assert bool(jnp.array_equal(y_eval, x))

    print("KERNEL_OK")
</pallas_src>

<mosaic_0001>
module attributes {stable_mosaic.version = 11 : i64} {
  func.func @_drop_path_kernel(%arg0: i32, %arg1: i32, %arg2: memref<2xf32, #tpu.memory_space<smem>>, %arg3: memref<2x8x128xf32, #tpu.memory_space<vmem>>, %arg4: memref<2x8x128xf32, #tpu.memory_space<vmem>>) attributes {dimension_semantics = [#tpu.dimension_semantics<parallel>, #tpu.dimension_semantics<parallel>], iteration_bounds = array<i64: 1, 1>, scalar_prefetch = 1 : i64, scratch_operands = 0 : i64, tpu.core_type = #tpu.core_type<tc>, window_params = [{transform_indices = @transform_0, window_bounds = array<i64: 2, 8, 128>}, {transform_indices = @transform_1, window_bounds = array<i64: 2, 8, 128>}]} {
    %c2_i32 = arith.constant 2 : i32
    %0 = arith.muli %arg0, %c2_i32 : i32
    %c0_i32 = arith.constant 0 : i32
    %1 = arith.addi %0, %c0_i32 : i32
    %2 = arith.index_cast %1 : i32 to index
    %3 = memref.load %arg2[%2] : memref<2xf32, #tpu.memory_space<smem>>
    %c0 = arith.constant 0 : index
    %c0_0 = arith.constant 0 : index
    %c0_1 = arith.constant 0 : index
    %4 = vector.load %arg3[%c0, %c0_0, %c0_1] : memref<2x8x128xf32, #tpu.memory_space<vmem>>, vector<1x8x128xf32>
    %5 = vector.shape_cast %4 : vector<1x8x128xf32> to vector<8x128xf32>
    %6 = vector.broadcast %3 : f32 to vector<8x128xf32>
    %7 = arith.mulf %5, %6 : vector<8x128xf32>
    %c0_2 = arith.constant 0 : index
    %c0_3 = arith.constant 0 : index
    %c0_4 = arith.constant 0 : index
    %8 = vector.load %arg4[%c0_2, %c0_3, %c0_4] : memref<2x8x128xf32, #tpu.memory_space<vmem>>, vector<1x8x128xf32>
    %9 = vector.shape_cast %8 : vector<1x8x128xf32> to vector<8x128xf32>
    %10 = vector.shape_cast %7 : vector<8x128xf32> to vector<1x8x128xf32>
    tpu.vector_store %arg4[%c0_2, %c0_3, %c0_4], %10 {strides = array<i32>} : memref<2x8x128xf32, #tpu.memory_space<vmem>>, vector<1x8x128xf32>,
    %c1_i32 = arith.constant 1 : i32
    %11 = arith.addi %0, %c1_i32 : i32
    %12 = arith.index_cast %11 : i32 to index
    %13 = memref.load %arg2[%12] : memref<2xf32, #tpu.memory_space<smem>>
    %c1 = arith.constant 1 : index
    %c0_5 = arith.constant 0 : index
    %c0_6 = arith.constant 0 : index
    %14 = vector.load %arg3[%c1, %c0_5, %c0_6] : memref<2x8x128xf32, #tpu.memory_space<vmem>>, vector<1x8x128xf32>
    %15 = vector.shape_cast %14 : vector<1x8x128xf32> to vector<8x128xf32>
    %16 = vector.broadcast %13 : f32 to vector<8x128xf32>
    %17 = arith.mulf %15, %16 : vector<8x128xf32>
    %c1_7 = arith.constant 1 : index
    %c0_8 = arith.constant 0 : index
    %c0_9 = arith.constant 0 : index
    %18 = vector.load %arg4[%c1_7, %c0_8, %c0_9] : memref<2x8x128xf32, #tpu.memory_space<vmem>>, vector<1x8x128xf32>
    %19 = vector.shape_cast %18 : vector<1x8x128xf32> to vector<8x128xf32>
    %20 = vector.shape_cast %17 : vector<8x128xf32> to vector<1x8x128xf32>
    tpu.vector_store %arg4[%c1_7, %c0_8, %c0_9], %20 {strides = array<i32>} : memref<2x8x128xf32, #tpu.memory_space<vmem>>, vector<1x8x128xf32>,
    return
  }
  func.func @transform_0(%arg0: i32, %arg1: i32, %arg2: memref<2xf32, #tpu.memory_space<smem>>) -> (i32, i32, i32) {
    %c0_i32 = arith.constant 0 : i32
    %c0_i32_0 = arith.constant 0 : i32
    return %arg0, %arg1, %c0_i32 : i32, i32, i32
  }
  func.func @transform_1(%arg0: i32, %arg1: i32, %arg2: memref<2xf32, #tpu.memory_space<smem>>) -> (i32, i32, i32) {
    %c0_i32 = arith.constant 0 : i32
    %c0_i32_0 = arith.constant 0 : i32
    return %arg0, %arg1, %c0_i32 : i32, i32, i32
  }
}

</mosaic_0001>

<bundles_post_ra>
// kernel: tpu_custom_call.1
= control target key start
LH: loop header
LB: loop body
LE: loop exit
PB: predicated region body
PF: predicated region fallthrough
CT: control target
= control target key end

     0   :  { %s139_s12 = smov [#allocation3]   ;;  %s168_s0 = inlined_call_operand.hbm [shape: f32[2], index: 0, kind: input, shape index: {}]   ;;  %s169_s1 = inlined_call_operand.hbm [shape: f32[2,8,128], index: 1, kind: input, shape index: {}]   ;;  %s170_s2 = inlined_call_operand.hbm [shape: f32[2,8,128], index: 2, kind: output, shape index: {}]  }
   0x1   :  { %s8_s11 = sshll.u32 %s168_s0, 4  ;;  %s9_s11 = int_to_ptr.hbm [resolvable:$true] %s8_s11 }
   0x2   :  { %11 = dma.hbm_to_smem %s9_s11, 16, %s139_s12, [#allocation2] }
   0x3   :  { %133 = dma.done.wait [#allocation2], 16 }
   0x4   :  { %134 = vsyncadd [#allocation2], 4294967280 }
   0x5   :  { %14 = sfence }
   0x6   :  { %15 = vsyncpa [#allocation5], 0 }
   0x7   :  { %16 = vsyncpa [#allocation6], 0  ;;  %s21_s15 = sshll.u32 %s169_s1, 4  ;;  %s140_s16 = smov [#allocation4]   ;;  %s22_s15 = int_to_ptr.hbm [resolvable:$true] %s21_s15 }
   0x8   :  { %s23_s17 = sshll.u32 %s140_s16, 4  ;;  %s141_s18 = smov 128   ;;  %s24_s17 = int_to_ptr.vmem [resolvable:$true] %s23_s17 }
   0x9   :  { %s142_s19 = smov 8  }
   0xa   :  { %29 = dma.hbm_to_vmem [thread:$0]  %s22_s15, 256, %s24_s17, [#allocation5], %s141_s18, %s141_s18, %s142_s19  }
   0xb   :  { %135 = dma.done.wait [#allocation5], 256  }
   0xc   :  { %136 = vsyncadd [#allocation5], 4294967040  ;;  %s35_s0 = sld [smem:[#allocation3]]  ;;  %s143_s21 = smov [#allocation7]   ;;  %v36_v0 = vld [vmem:[#allocation4] sm:$0xff]  ;;  %v43_v2 = vld [vmem:[#allocation4 + $0x8] sm:$0xff] }
   0xd   :  { %s67_s20 = sld [smem:[#allocation3 + $0x1]]  ;;  %s52_s22 = sshll.u32 %s143_s21, 4  ;;  %s53_s22 = int_to_ptr.vmem [resolvable:$true] %s52_s22 }
   0xe   :  { %s54_s25 = sshll.u32 %s170_s2, 4  ;;  %s55_s25 = int_to_ptr.hbm [resolvable:$true] %s54_s25 }
  0x12   :  { %v37_v1 = vstv %s35_s0 }
  0x13   :  { %v38_v3 = vmul.f32 %v37_v1, %v36_v0  ;;  %v44_v4 = vstv %s67_s20 }
  0x14   :  { %v45_v5 = vmul.f32 %v44_v4, %v43_v2 }
  0x15   :  { %39 = vst [vmem:[#allocation7] sm:$0xff] %v38_v3 }
  0x16   :  { %47 = vst [vmem:[#allocation7 + $0x8] sm:$0xff] %v45_v5 }
  0x17   :  { %60 = dma.vmem_to_hbm [thread:$0]  %s53_s22, 256, %s55_s25, [#allocation6], %s141_s18, %s141_s18, %s142_s19  }
  0x18   :  { %137 = dma.done.wait [#allocation6], 256  }
  0x19   :  { %138 = vsyncadd [#allocation6], 4294967040 }
  0x1a   :  { %65 = vsyncpa [#allocation5], 1 }
  0x1b   :  { %66 = vsyncpa [#allocation6], 1 }

</bundles_post_ra>
